<compile_context>
chip_gen: v7x
topology: tpu7x:2x2x1
jax: 0.10.0
libtpu: 0.0.40
codegen_flags: <defaults>
</compile_context>

<pallas_src>
import jax
import jax.numpy as jnp
from jax.experimental import pallas as pl
from jax.experimental.pallas import tpu as pltpu


def _round_up(v, m):
    return ((v + m - 1) // m) * m


def _pick_b_tile(N, per_sample_bytes, budget, min_batch_blocks):
    max_b = max(1, budget // max(1, per_sample_bytes))
    max_b = min(max_b, N)
    if min_batch_blocks > 1:
        # Only cap (to guarantee >=2 batch grid steps) when explicitly asked for,
        # e.g. min_batch_blocks=2 on 2-TC v7x for megacore sharding.
        max_b = min(max_b, max(1, N // min_batch_blocks))
    return max(1, max_b)


def _choose_tiling(N, C, HW, itemsize, budget, min_batch_blocks):
    """Decide how to tile x viewed as (N, C, HW).

    Returns ("channel", b_tile, t_c): blocks (b_tile, t_c, HW), inner grid over C.
         or ("spatial", b_tile, t_hw): blocks (b_tile, C, t_hw), inner grid over HW.
    """
    full_row = C * HW * itemsize            # one sample, all channels, full spatial
    if full_row <= budget:
        b_tile = _pick_b_tile(N, full_row, budget, min_batch_blocks)
        return "channel", b_tile, C

    # Channel tiling: largest t_c that divides C, is a multiple of 8 (sublane),
    # and whose (t_c, HW) native-dtype slab fits the budget.
    best_tc = 0
    t = 8
    while t < C:
        if C % t == 0 and t * HW * itemsize <= budget:
            best_tc = t
        t += 8
    if best_tc > 0:
        b_tile = _pick_b_tile(N, best_tc * HW * itemsize, budget, min_batch_blocks)
        return "channel", b_tile, best_tc

    # Fallback: tile the spatial (lane) axis; tile is a multiple of 128.
    t_hw = (budget // (C * itemsize)) // 128 * 128
    t_hw = max(128, t_hw)
    if t_hw >= HW:
        t_hw = HW                            # single (possibly unaligned) full-dim block
    b_tile = _pick_b_tile(N, C * t_hw * itemsize, budget, min_batch_blocks)
    return "spatial", b_tile, t_hw


def _make_channel_kernel(hw_true, num_c):
    """x blocks are (b_tile, t_c, HW): full spatial per block, grid over channel chunks.
    fc1 is accumulated per channel chunk; relu/fc2/sigmoid run in the epilogue."""
    inv_hw = 1.0 / float(hw_true)

    def kernel(x_ref, w1t_ref, w2t_ref, o_ref, h_avg, h_max):
        c_idx = pl.program_id(1)

        @pl.when(c_idx == 0)
        def _init():
            h_avg[...] = jnp.zeros_like(h_avg)
            h_max[...] = jnp.zeros_like(h_max)

        # Upcast AFTER the DMA so HBM traffic stays at the native dtype width.
        x = x_ref[...].astype(jnp.float32)                     # (B, t_c, HW)
        avg_c = jnp.sum(x, axis=-1) * inv_hw                   # (B, t_c)
        max_c = jnp.max(x, axis=-1)                            # (B, t_c)

        w1t = w1t_ref[...]                                     # (t_c, hidden) f32
        # Partial fc1 contributions; relu is applied after the full sum over C.
        h_avg[...] += jnp.dot(avg_c, w1t, preferred_element_type=jnp.float32)
        h_max[...] += jnp.dot(max_c, w1t, preferred_element_type=jnp.float32)

        @pl.when(c_idx == num_c - 1)
        def _finalize():
            w2t = w2t_ref[...]                                 # (hidden, C) f32
            y_avg = jnp.dot(jnp.maximum(h_avg[...], 0.0), w2t,
                            preferred_element_type=jnp.float32)
            y_max = jnp.dot(jnp.maximum(h_max[...], 0.0), w2t,
                            preferred_element_type=jnp.float32)
            o_ref[...] = jax.nn.sigmoid(y_avg + y_max)[:, None, :]

    return kernel


def _make_spatial_kernel(hw_true, t_hw, num_hw):
    """x blocks are (b_tile, C, t_hw): full channels per block, grid over spatial tiles.
    Only the final ragged tile (if any) pays for lane masking."""
    inv_hw = 1.0 / float(hw_true)
    rem = hw_true - (num_hw - 1) * t_hw            # valid lanes in the last tile
    ragged = (num_hw > 1) and (rem != t_hw)
    rem128 = min(t_hw, _round_up(rem, 128))        # 128-aligned slice covering the tail

    def kernel(x_ref, w1t_ref, w2t_ref, o_ref, sum_acc, max_acc):
        hw_idx = pl.program_id(1)
        last = num_hw - 1

        @pl.when(hw_idx == 0)
        def _init():
            sum_acc[...] = jnp.zeros_like(sum_acc)
            max_acc[...] = jnp.full_like(max_acc, -jnp.inf)

        if ragged:
            @pl.when(hw_idx != last)
            def _acc_full():
                x = x_ref[...].astype(jnp.float32)             # (B, C, t_hw)
                sum_acc[...] += jnp.sum(x, axis=-1)
                max_acc[...] = jnp.maximum(max_acc[...], jnp.max(x, axis=-1))

            @pl.when(hw_idx == last)
            def _acc_masked():
                # Only the trailing (<=128-rounded) slice of the ragged block is
                # touched; out-of-range lanes hold garbage and must be masked.
                x = x_ref[:, :, :rem128].astype(jnp.float32)   # (B, C, rem128)
                lane = jax.lax.broadcasted_iota(jnp.int32, (1, 1, rem128), 2)
                valid = lane < rem
                sum_acc[...] += jnp.sum(jnp.where(valid, x, 0.0), axis=-1)
                max_acc[...] = jnp.maximum(
                    max_acc[...],
                    jnp.max(jnp.where(valid, x, -jnp.inf), axis=-1))
        else:
            x = x_ref[...].astype(jnp.float32)
            sum_acc[...] += jnp.sum(x, axis=-1)
            max_acc[...] = jnp.maximum(max_acc[...], jnp.max(x, axis=-1))

        @pl.when(hw_idx == last)
        def _finalize():
            avg = sum_acc[...] * inv_hw                        # (B, C)
            mx = max_acc[...]                                  # (B, C)

            def mlp(v):
                h = jnp.maximum(jnp.dot(v, w1t_ref[...],
                                        preferred_element_type=jnp.float32), 0.0)
                return jnp.dot(h, w2t_ref[...], preferred_element_type=jnp.float32)

            o_ref[...] = jax.nn.sigmoid(mlp(avg) + mlp(mx))[:, None, :]

    return kernel


def channel_attention(x, w1, w2, *,
                      x_block_budget=8 * 1024 * 1024,
                      vmem_limit_bytes=48 * 1024 * 1024,
                      min_batch_blocks=1):
    """x: (N, C, H, W) NCHW (any float dtype; streamed in its native dtype).
    w1: (C//16, C) fc1 weight.  w2: (C, C//16) fc2 weight.
    Returns (N, C, 1, 1) float32, matching the PyTorch module.

    v7x: pass min_batch_blocks=2 (megacore) and keep the defaults
    (8 MiB blocks / 48 MiB VMEM limit fit its 64 MiB VMEM).
    v5e/v6e: optionally raise x_block_budget to 16 MiB and vmem_limit_bytes
    to 64-96 MiB (128 MiB physical VMEM)."""
    N, C, H, W = x.shape
    hidden = w1.shape[0]
    HW = H * W
    itemsize = jnp.dtype(x.dtype).itemsize

    mode, b_tile, t_inner = _choose_tiling(
        N, C, HW, itemsize, x_block_budget, min_batch_blocks)
    grid_b = pl.cdiv(N, b_tile)

    # Contiguous NCHW -> (N, C, HW) is a free reshape; no dtype change, NO pad.
    x3 = x.reshape(N, C, HW)

    # Weights are tiny: hold them transposed in f32.
    w1t = jnp.transpose(w1).astype(jnp.float32)                # (C, hidden)
    w2t = jnp.transpose(w2).astype(jnp.float32)                # (hidden, C)

    if mode == "channel":
        t_c = t_inner
        num_inner = C // t_c
        kernel = _make_channel_kernel(HW, num_inner)
        in_specs = [
            pl.BlockSpec((b_tile, t_c, HW), lambda b, c: (b, c, 0)),
            pl.BlockSpec((t_c, hidden), lambda b, c: (c, 0)),
            pl.BlockSpec((hidden, C), lambda b, c: (0, 0)),
        ]
        scratch = [pltpu.VMEM((b_tile, hidden), jnp.float32),  # fc1(avg) accumulator
                   pltpu.VMEM((b_tile, hidden), jnp.float32)]  # fc1(max) accumulator
    else:
        t_hw = t_inner
        num_inner = pl.cdiv(HW, t_hw)
        kernel = _make_spatial_kernel(HW, t_hw, num_inner)
        in_specs = [
            pl.BlockSpec((b_tile, C, t_hw), lambda b, h: (b, 0, h)),
            pl.BlockSpec((C, hidden), lambda b, h: (0, 0)),
            pl.BlockSpec((hidden, C), lambda b, h: (0, 0)),
        ]
        scratch = [pltpu.VMEM((b_tile, C), jnp.float32),       # running sum
                   pltpu.VMEM((b_tile, C), jnp.float32)]       # running max

    out = pl.pallas_call(
        kernel,
        out_shape=jax.ShapeDtypeStruct((N, 1, C), jnp.float32),
        grid_spec=pltpu.PrefetchScalarGridSpec(
            num_scalar_prefetch=0,
            grid=(grid_b, num_inner),
            in_specs=in_specs,
            out_specs=pl.BlockSpec((b_tile, 1, C), lambda b, i: (b, 0, 0)),
            scratch_shapes=scratch,
        ),
        compiler_params=pltpu.CompilerParams(
            dimension_semantics=("parallel", "arbitrary"),
            vmem_limit_bytes=vmem_limit_bytes,
        ),
    )(x3, w1t, w2t)

    return out.reshape(N, C, 1, 1)


def channel_attention_ref(x, w1, w2):
    """Plain-JAX reference mirroring the PyTorch module."""
    x = x.astype(jnp.float32)
    avg = jnp.mean(x, axis=(2, 3))                             # (N, C)
    mx = jnp.max(x, axis=(2, 3))                               # (N, C)

    def mlp(v):
        h = jnp.maximum(v @ w1.T, 0.0)                         # (N, hidden)
        return h @ w2.T                                        # (N, C)

    out = jax.nn.sigmoid(mlp(avg) + mlp(mx))
    return out[:, :, None, None]


def _make_inputs(key, N, C, H, W, dtype=jnp.float32):
    hidden = C // 16
    kx, k1, k2 = jax.random.split(key, 3)
    x = jax.random.normal(kx, (N, C, H, W), dtype=jnp.float32).astype(dtype)
    # Conv2d(C, hidden, 1, bias=False).weight -> (hidden, C)
    w1 = jax.random.normal(k1, (hidden, C), dtype=jnp.float32) * (1.0 / C) ** 0.5
    # Conv2d(hidden, C, 1, bias=False).weight -> (C, hidden)
    w2 = jax.random.normal(k2, (C, hidden), dtype=jnp.float32) * (1.0 / hidden) ** 0.5
    return x, w1, w2


if __name__ == "__main__":
    key = jax.random.PRNGKey(0)
    k1, k2, k3, k4 = jax.random.split(key, 4)

    # ---- Test 1: f32, everything fits in one block (channel mode, 1 inner step).
    x, w1, w2 = _make_inputs(k1, N=2, C=64, H=16, W=16)
    out = jax.block_until_ready(channel_attention(x, w1, w2))
    ref = channel_attention_ref(x, w1, w2)
    assert out.shape == (2, 64, 1, 1), out.shape
    assert jnp.allclose(out, ref, atol=1e-5, rtol=1e-5), "mismatch (test 1)"

    # ---- Test 2: ragged batch grid (N=3, b_tile=2 via a 128 KiB budget).
    x, w1, w2 = _make_inputs(k2, N=3, C=64, H=16, W=16)
    out = jax.block_until_ready(
        channel_attention(x, w1, w2, x_block_budget=128 * 1024))
    ref = channel_attention_ref(x, w1, w2)
    assert out.shape == (3, 64, 1, 1), out.shape
    assert jnp.allclose(out, ref, atol=1e-5, rtol=1e-5), "mismatch (test 2)"

    # ---- Test 3: bf16 input, channel-axis tiling (t_c=8, 4 channel steps),
    # non-128-multiple spatial (14x14) kept as one contiguous full-HW run.
    x, w1, w2 = _make_inputs(k3, N=2, C=32, H=14, W=14, dtype=jnp.bfloat16)
    out = jax.block_until_ready(
        channel_attention(x, w1, w2, x_block_budget=4 * 1024))
    ref = channel_attention_ref(x, w1, w2)
    assert out.shape == (2, 32, 1, 1), out.shape
    assert jnp.allclose(out, ref, atol=2e-5, rtol=2e-5), "mismatch (test 3)"

    # ---- Test 4: spatial-tiling fallback with a ragged, masked last tile
    # (f32, HW=196, t_hw=128 -> 2 spatial tiles, no wrapper pad).
    x, w1, w2 = _make_inputs(k4, N=2, C=32, H=14, W=14)
    out = jax.block_until_ready(
        channel_attention(x, w1, w2, x_block_budget=4 * 1024))
    ref = channel_attention_ref(x, w1, w2)
    assert out.shape == (2, 32, 1, 1), out.shape
    assert jnp.allclose(out, ref, atol=1e-5, rtol=1e-5), "mismatch (test 4)"

    print("KERNEL_OK")
</pallas_src>

<mosaic_0001>
module attributes {stable_mosaic.version = 11 : i64} {
  func.func @kernel(%arg0: i32, %arg1: i32, %arg2: memref<2x64x256xf32, #tpu.memory_space<vmem>>, %arg3: memref<64x4xf32, #tpu.memory_space<vmem>>, %arg4: memref<4x64xf32, #tpu.memory_space<vmem>>, %arg5: memref<2x1x64xf32, #tpu.memory_space<vmem>>, %arg6: memref<2x4xf32, #tpu.memory_space<vmem>>, %arg7: memref<2x4xf32, #tpu.memory_space<vmem>>) attributes {dimension_semantics = [#tpu.dimension_semantics<parallel>, #tpu.dimension_semantics<arbitrary>], iteration_bounds = array<i64: 1, 1>, scalar_prefetch = 0 : i64, scratch_operands = 2 : i64, tpu.core_type = #tpu.core_type<tc>, window_params = [{transform_indices = @transform_0, window_bounds = array<i64: 2, 64, 256>}, {transform_indices = @transform_1, window_bounds = array<i64: 64, 4>}, {pipeline_mode = #tpu.pipeline_mode<synchronous>, transform_indices = @transform_2, window_bounds = array<i64: 4, 64>}, {transform_indices = @transform_3, window_bounds = array<i64: 2, 1, 64>}]} {
    %c0_i32 = arith.constant 0 : i32
    %0 = arith.cmpi eq, %arg1, %c0_i32 : i32
    %1 = arith.extui %0 : i1 to i32
    %c0_i32_0 = arith.constant 0 : i32
    %2 = arith.cmpi ne, %1, %c0_i32_0 : i32
    scf.if %2 {
      %cst_19 = arith.constant 0.000000e+00 : f32
      %20 = vector.broadcast %cst_19 : f32 to vector<2x4xf32>
      %c0_20 = arith.constant 0 : index
      %c0_21 = arith.constant 0 : index
      %21 = vector.load %arg6[%c0_20, %c0_21] : memref<2x4xf32, #tpu.memory_space<vmem>>, vector<2x4xf32>
      tpu.vector_store %arg6[%c0_20, %c0_21], %20 {strides = array<i32>} : memref<2x4xf32, #tpu.memory_space<vmem>>, vector<2x4xf32>,
      %cst_22 = arith.constant 0.000000e+00 : f32
      %22 = vector.broadcast %cst_22 : f32 to vector<2x4xf32>
      %c0_23 = arith.constant 0 : index
      %c0_24 = arith.constant 0 : index
      %23 = vector.load %arg7[%c0_23, %c0_24] : memref<2x4xf32, #tpu.memory_space<vmem>>, vector<2x4xf32>
      tpu.vector_store %arg7[%c0_23, %c0_24], %22 {strides = array<i32>} : memref<2x4xf32, #tpu.memory_space<vmem>>, vector<2x4xf32>,
    } else {
    }
    %c0 = arith.constant 0 : index
    %c0_1 = arith.constant 0 : index
    %c0_2 = arith.constant 0 : index
    %3 = vector.load %arg2[%c0, %c0_1, %c0_2] : memref<2x64x256xf32, #tpu.memory_space<vmem>>, vector<2x64x256xf32>
    %cst = arith.constant dense<0.000000e+00> : vector<2x64xf32>
    %4 = vector.multi_reduction <add>, %3, %cst [2] : vector<2x64x256xf32> to vector<2x64xf32>
    %cst_3 = arith.constant 3.906250e-03 : f32
    %5 = vector.broadcast %cst_3 : f32 to vector<2x64xf32>
    %6 = arith.mulf %4, %5 : vector<2x64xf32>
    %cst_4 = arith.constant dense<0xFF800000> : vector<2x64xf32>
    %7 = vector.multi_reduction <maximumf>, %3, %cst_4 [2] : vector<2x64x256xf32> to vector<2x64xf32>
    %c0_5 = arith.constant 0 : index
    %c0_6 = arith.constant 0 : index
    %8 = vector.load %arg3[%c0_5, %c0_6] : memref<64x4xf32, #tpu.memory_space<vmem>>, vector<64x4xf32>
    %c0_7 = arith.constant 0 : index
    %c0_8 = arith.constant 0 : index
    %9 = vector.load %arg6[%c0_7, %c0_8] : memref<2x4xf32, #tpu.memory_space<vmem>>, vector<2x4xf32>
    %cst_9 = arith.constant dense<0.000000e+00> : vector<2x4xf32>
    %10 = tpu.matmul %6, %8, %cst_9 {dimension_numbers = #tpu.dot_dimension_numbers<[1], [0], [0], [1], [0, 0, 1, 1], [], []>} : vector<2x64xf32>, vector<64x4xf32>, vector<2x4xf32> -> vector<2x4xf32>
    %11 = arith.addf %9, %10 : vector<2x4xf32>
    %c0_10 = arith.constant 0 : index
    %c0_11 = arith.constant 0 : index
    %12 = vector.load %arg6[%c0_10, %c0_11] : memref<2x4xf32, #tpu.memory_space<vmem>>, vector<2x4xf32>
    tpu.vector_store %arg6[%c0_10, %c0_11], %11 {strides = array<i32>} : memref<2x4xf32, #tpu.memory_space<vmem>>, vector<2x4xf32>,
    %c0_12 = arith.constant 0 : index
    %c0_13 = arith.constant 0 : index
    %13 = vector.load %arg7[%c0_12, %c0_13] : memref<2x4xf32, #tpu.memory_space<vmem>>, vector<2x4xf32>
    %cst_14 = arith.constant dense<0.000000e+00> : vector<2x4xf32>
    %14 = tpu.matmul %7, %8, %cst_14 {dimension_numbers = #tpu.dot_dimension_numbers<[1], [0], [0], [1], [0, 0, 1, 1], [], []>} : vector<2x64xf32>, vector<64x4xf32>, vector<2x4xf32> -> vector<2x4xf32>
    %15 = arith.addf %13, %14 : vector<2x4xf32>
    %c0_15 = arith.constant 0 : index
    %c0_16 = arith.constant 0 : index
    %16 = vector.load %arg7[%c0_15, %c0_16] : memref<2x4xf32, #tpu.memory_space<vmem>>, vector<2x4xf32>
    tpu.vector_store %arg7[%c0_15, %c0_16], %15 {strides = array<i32>} : memref<2x4xf32, #tpu.memory_space<vmem>>, vector<2x4xf32>,
    %c0_i32_17 = arith.constant 0 : i32
    %17 = arith.cmpi eq, %arg1, %c0_i32_17 : i32
    %18 = arith.extui %17 : i1 to i32
    %c0_i32_18 = arith.constant 0 : i32
    %19 = arith.cmpi ne, %18, %c0_i32_18 : i32
    scf.if %19 {
      %c0_19 = arith.constant 0 : index
      %c0_20 = arith.constant 0 : index
      %20 = vector.load %arg4[%c0_19, %c0_20] : memref<4x64xf32, #tpu.memory_space<vmem>>, vector<4x64xf32>
      %c0_21 = arith.constant 0 : index
      %c0_22 = arith.constant 0 : index
      %21 = vector.load %arg6[%c0_21, %c0_22] : memref<2x4xf32, #tpu.memory_space<vmem>>, vector<2x4xf32>
      %cst_23 = arith.constant 0.000000e+00 : f32
      %22 = vector.broadcast %cst_23 : f32 to vector<2x4xf32>
      %23 = arith.maximumf %21, %22 : vector<2x4xf32>
      %cst_24 = arith.constant dense<0.000000e+00> : vector<2x64xf32>
      %24 = tpu.matmul %23, %20, %cst_24 {dimension_numbers = #tpu.dot_dimension_numbers<[1], [0], [0], [1], [0, 0, 1, 1], [], []>} : vector<2x4xf32>, vector<4x64xf32>, vector<2x64xf32> -> vector<2x64xf32>
      %c0_25 = arith.constant 0 : index
      %c0_26 = arith.constant 0 : index
      %25 = vector.load %arg7[%c0_25, %c0_26] : memref<2x4xf32, #tpu.memory_space<vmem>>, vector<2x4xf32>
      %cst_27 = arith.constant 0.000000e+00 : f32
      %26 = vector.broadcast %cst_27 : f32 to vector<2x4xf32>
      %27 = arith.maximumf %25, %26 : vector<2x4xf32>
      %cst_28 = arith.constant dense<0.000000e+00> : vector<2x64xf32>
      %28 = tpu.matmul %27, %20, %cst_28 {dimension_numbers = #tpu.dot_dimension_numbers<[1], [0], [0], [1], [0, 0, 1, 1], [], []>} : vector<2x4xf32>, vector<4x64xf32>, vector<2x64xf32> -> vector<2x64xf32>
      %29 = arith.addf %24, %28 : vector<2x64xf32>
      %30 = arith.negf %29 : vector<2x64xf32>
      %31 = math.exp %30 : vector<2x64xf32>
      %cst_29 = arith.constant 1.000000e+00 : f32
      %32 = vector.broadcast %cst_29 : f32 to vector<2x64xf32>
      %33 = arith.addf %32, %31 : vector<2x64xf32>
      %34 = arith.divf %32, %33 : vector<2x64xf32>
      %35 = vector.shape_cast %34 : vector<2x64xf32> to vector<2x1x64xf32>
      %c0_30 = arith.constant 0 : index
      %c0_31 = arith.constant 0 : index
      %c0_32 = arith.constant 0 : index
      %36 = vector.load %arg5[%c0_30, %c0_31, %c0_32] : memref<2x1x64xf32, #tpu.memory_space<vmem>>, vector<2x1x64xf32>
      tpu.vector_store %arg5[%c0_30, %c0_31, %c0_32], %35 {strides = array<i32>} : memref<2x1x64xf32, #tpu.memory_space<vmem>>, vector<2x1x64xf32>,
    } else {
    }
    return
  }
  func.func @transform_0(%arg0: i32, %arg1: i32) -> (i32, i32, i32) {
    %c0_i32 = arith.constant 0 : i32
    %c0_i32_0 = arith.constant 0 : i32
    return %arg0, %arg1, %c0_i32 : i32, i32, i32
  }
  func.func @transform_1(%arg0: i32, %arg1: i32) -> (i32, i32) {
    %c0_i32 = arith.constant 0 : i32
    %c0_i32_0 = arith.constant 0 : i32
    return %arg1, %c0_i32 : i32, i32
  }
  func.func @transform_2(%arg0: i32, %arg1: i32) -> (i32, i32) {
    %c0_i32 = arith.constant 0 : i32
    %c0_i32_0 = arith.constant 0 : i32
    %c0_i32_1 = arith.constant 0 : i32
    return %c0_i32, %c0_i32_0 : i32, i32
  }
  func.func @transform_3(%arg0: i32, %arg1: i32) -> (i32, i32, i32) {
    %c0_i32 = arith.constant 0 : i32
    %c0_i32_0 = arith.constant 0 : i32
    %c0_i32_1 = arith.constant 0 : i32
    return %arg0, %c0_i32, %c0_i32_0 : i32, i32, i32
  }
}

</mosaic_0001>

<bundles_post_ra>
// kernel: tpu_custom_call.1
= control target key start
LH: loop header
LB: loop body
LE: loop exit
PB: predicated region body
PF: predicated region fallthrough
CT: control target
= control target key end

     0   :  { %8 = vsyncpa [#allocation5], 0  ;;  %s1140_s0 = inlined_call_operand.hbm [shape: f32[2,64,256], index: 0, kind: input, shape index: {}]   ;;  %s1141_s1 = inlined_call_operand.vmem [shape: f32[64,4], index: 1, kind: input, shape index: {}]   ;;  %s1142_s2 = inlined_call_operand.vmem [shape: f32[4,64], index: 2, kind: input, shape index: {}]   ;;  %s1143_s3 = inlined_call_operand.hbm [shape: f32[2,1,64], index: 3, kind: output, shape index: {}]  }
   0x1   :  { %9 = vsyncpa [#allocation6], 0  ;;  %s920_s12 = smov [#allocation4]   ;;  %s872_s16 = scalar_lea.hbm %s1140_s0, 4096 }
   0x2   :  { %s15_s13 = sshll.u32 %s920_s12, 4  ;;  %p873_p0 = scmp.ne.s32.totalorder %s1140_s0, %s872_s16  ;;  %s16_s13 = int_to_ptr.vmem [resolvable:$true] %s15_s13 }
   0x3   :  { %p876_p1 = scmp.lt.u32.totalorder %s872_s16, %s1140_s0 }
   0x5   :  { %p878_p2 = pnand %p876_p1, %p873_p0 }
   0x7   :  { %881 = shalt.err (!%p878_p2)
}
   0x8   :  { %s882_s21 = scalar_lea.vmem %s16_s13, 4096  ;;  %p887_p4 = scmp.lt.s32.totalorder %s16_s13, %s16_s13 }
   0x9   :  { %p883_p3 = scmp.ne.s32.totalorder %s16_s13, %s882_s21  ;;  %p888_p5 = scmp.lt.s32.totalorder %s882_s21, %s882_s21 }
   0xb   :  { %p889_p6 = por %p888_p5, %p887_p4 }
   0xd   :  { %p890_p7 = pnand %p889_p6, %p883_p3 }
   0xf   :  { %893 = shalt.err (!%p890_p7)
}
  0x10   :  { %s921_s22 = smov 256   ;;  %s922_s23 = smov 16  }
  0x11   :  { %21 = dma.hbm_to_vmem [thread:$0]  %s1140_s0, 4096, %s16_s13, [#allocation5], %s921_s22, %s921_s22, %s922_s23  }
  0x12   :  { %916 = dma.done.wait [#allocation5], 4096  }
  0x13   :  { %917 = vsyncadd [#allocation5], 4294963200  ;;  %v52_v0 = vld [vmem:[#allocation4 + $0x80] sm:$0xff]  ;;  %v53_v1 = vld [vmem:[#allocation4 + $0x88] sm:$0xff]  ;;  %vm924_vm0 = vmmov 0   ;;  %vm33_vm1 = vcmask 25600  }
  0x14   :  { %v36_v2 = vld [vmem:[#allocation4] sm:$0xff]  ;;  %v92_v3 = vadd.f32 %v53_v1, %v52_v0  ;;  %v37_v4 = vld [vmem:[#allocation4 + $0x8] sm:$0xff]  ;;  %v54_v5 = vld [vmem:[#allocation4 + $0x90] sm:$0xff]  ;;  %v156_v27 = vmax.f32 %v52_v0, %v53_v1  ;;  %v923_v1 = vmov 0.0|0.0   ;;  %vm216_vm2 = vcmask 130112  }
  0x15   :  { %v55_v6 = vld [vmem:[#allocation4 + $0x98] sm:$0xff]  ;;  %v68_v7 = vadd.f32 %v37_v4, %v36_v2  ;;  %v38_v8 = vld [vmem:[#allocation4 + $0x10] sm:$0xff]  ;;  %v56_v12 = vld [vmem:[#allocation4 + $0xa0] sm:$0xff]  ;;  %v132_v25 = vmax.f32 %v36_v2, %v37_v4  ;;  %834 = vmatprep.subr.bf16.mxu0 %v923_v1  ;;  %846 = vmatprep.subr.bf16.mxu1 %v923_v1  ;;  %vm223_vm3 = vcmask 195712   ;;  %vm230_vm4 = vcmask 261312  }
  0x16   :  { %v39_v9 = vld [vmem:[#allocation4 + $0x18] sm:$0xff]  ;;  %93 = vadd.xlane.f32.xlu1 %v92_v3  ;;  %v95_v10 = vadd.f32 %v55_v6, %v54_v5  ;;  %v57_v13 = vld [vmem:[#allocation4 + $0xa8] sm:$0xff]  ;;  %v40_v14 = vld [vmem:[#allocation4 + $0x20] sm:$0xff]  ;;  %v159_v26 = vmax.f32 %v54_v5, %v55_v6  ;;  %vm237_vm5 = vcmask 326912   ;;  %vm244_vm6 = vcmask 392512  }
  0x17   :  { %69 = vadd.xlane.f32.xlu0 %v68_v7  ;;  %v71_v11 = vadd.f32 %v39_v9, %v38_v8  ;;  %v41_v15 = vld [vmem:[#allocation4 + $0x28] sm:$0xff]  ;;  %v98_v16 = vadd.f32 %v57_v13, %v56_v12  ;;  %v58_v18 = vld [vmem:[#allocation4 + $0xb0] sm:$0xff]  ;;  %v59_v19 = vld [vmem:[#allocation4 + $0xb8] sm:$0xff]  ;;  %v135_v24 = vmax.f32 %v38_v8, %v39_v9  ;;  %v162_v34 = vmax.f32 %v56_v12, %v57_v13 }
  0x18   :  { %v74_v17 = vadd.f32 %v41_v15, %v40_v14  ;;  %v42_v20 = vld [vmem:[#allocation4 + $0x30] sm:$0xff]  ;;  %v43_v21 = vld [vmem:[#allocation4 + $0x38] sm:$0xff]  ;;  %v101_v22 = vadd.f32 %v59_v19, %v58_v18  ;;  %v60_v28 = vld [vmem:[#allocation4 + $0xc0] sm:$0xff]  ;;  %v138_v35 = vmax.f32 %v40_v14, %v41_v15  ;;  %v165_v42 = vmax.f32 %v58_v18, %v59_v19 }
  0x19   :  { %v77_v23 = vadd.f32 %v43_v21, %v42_v20  ;;  %v61_v29 = vld [vmem:[#allocation4 + $0xc8] sm:$0xff]  ;;  %v44_v30 = vld [vmem:[#allocation4 + $0x40] sm:$0xff]  ;;  %v62_v36 = vld [vmem:[#allocation4 + $0xd0] sm:$0xff]  ;;  %v141_v43 = vmax.f32 %v42_v20, %v43_v21  ;;  %v925_v13 = vmov 0.0   ;;  %vm251_vm7 = vcmask 458112  }
  0x1a   :  { %96 = vadd.xlane.f32.xlu1 %v95_v10  ;;  %v45_v31 = vld [vmem:[#allocation4 + $0x48] sm:$0xff]  ;;  %v104_v32 = vadd.f32 %v61_v29, %v60_v28  ;;  %v63_v37 = vld [vmem:[#allocation4 + $0xd8] sm:$0xff]  ;;  %v46_v38 = vld [vmem:[#allocation4 + $0x50] sm:$0xff]  ;;  %v168_v50 = vmax.f32 %v60_v28, %v61_v29  ;;  %802 = vmatprep.mubr.msk.f32.mxu0 %vm924_vm0, %v925_v13  ;;  %34 = vst.msk [vmem:[#allocation2] sm:$0x3] %vm33_vm1, %v925_v13  ;;  %v205_v28 = vlaneseq  ;;  %vm258_vm8 = vcmask 523712  }
  0x1b   :  { %72 = vadd.xlane.f32.xlu0 %v71_v11  ;;  %v80_v33 = vadd.f32 %v45_v31, %v44_v30  ;;  %v47_v39 = vld [vmem:[#allocation4 + $0x58] sm:$0xff]  ;;  %v107_v40 = vadd.f32 %v63_v37, %v62_v36  ;;  %v64_v44 = vld [vmem:[#allocation4 + $0xe0] sm:$0xff]  ;;  %v65_v45 = vld [vmem:[#allocation4 + $0xe8] sm:$0xff]  ;;  %v144_v51 = vmax.f32 %v44_v30, %v45_v31  ;;  %v171_v58 = vmax.f32 %v62_v36, %v63_v37 }
  0x1c   :  { %v83_v41 = vadd.f32 %v47_v39, %v46_v38  ;;  %v48_v46 = vld [vmem:[#allocation4 + $0x60] sm:$0xff]  ;;  %v49_v47 = vld [vmem:[#allocation4 + $0x68] sm:$0xff]  ;;  %v110_v48 = vadd.f32 %v65_v45, %v64_v44  ;;  %v66_v52 = vld [vmem:[#allocation4 + $0xf0] sm:$0xff]  ;;  %v147_v59 = vmax.f32 %v46_v38, %v47_v39  ;;  %v174_v62 = vmax.f32 %v64_v44, %v65_v45  ;;  %821 = vmatprep.mubr.msk.f32.mxu1 %vm924_vm0, %v925_v13 }
  0x1d   :  { %v86_v49 = vadd.f32 %v49_v47, %v48_v46  ;;  %v67_v53 = vld [vmem:[#allocation4 + $0xf8] sm:$0xff]  ;;  %v50_v54 = vld [vmem:[#allocation4 + $0x70] sm:$0xff]  ;;  %v181_v61 = vld [vmem:[%s1141_s1 + $0x8] sm:$0xff]  ;;  %v150_v0 = vmax.f32 %v48_v46, %v49_v47  ;;  %35 = vst.msk [vmem:[#allocation3] sm:$0x3] %vm33_vm1, %v925_v13  ;;  %v206_v31 = vand.u32 127, %v205_v28 }
  0x1e   :  { %99 = vadd.xlane.f32.xlu1 %v98_v16  ;;  %v51_v55 = vld [vmem:[#allocation4 + $0x78] sm:$0xff]  ;;  %v113_v56 = vadd.f32 %v67_v53, %v66_v52  ;;  %v182_v2 = vld [vmem:[%s1141_s1 + $0x10] sm:$0xff]  ;;  %v177_v4 = vmax.f32 %v66_v52, %v67_v53  ;;  %v185_v8 = vld [vmem:[%s1141_s1 + $0x28] sm:$0xff]  ;;  %vm299_vm9 = vcmask 1041409   ;;  %vm301_vm10 = vcmask 523264  }
  0x1f   :  { %75 = vadd.xlane.f32.xlu0 %v74_v17  ;;  %v89_v57 = vadd.f32 %v51_v55, %v50_v54  ;;  %v180_v60 = vld [vmem:[%s1141_s1] sm:$0xff]  ;;  %v183_v3 = vld [vmem:[%s1141_s1 + $0x18] sm:$0xff]  ;;  %v153_v6 = vmax.f32 %v50_v54, %v51_v55  ;;  %v186_v10 = vld [vmem:[%s1141_s1 + $0x30] sm:$0xff]  ;;  %v218_v36 = vadd.s32 4294967280, %v206_v31  ;;  %v225_v37 = vadd.s32 4294967272, %v206_v31 }
  0x20   :  { %v835_v63 = vpack.c.bf16 %v181_v61, %v180_v60  ;;  %v838_v5 = vpack.c.bf16 %v183_v3, %v182_v2  ;;  %v184_v7 = vld [vmem:[%s1141_s1 + $0x20] sm:$0xff]  ;;  %v187_v11 = vld [vmem:[%s1141_s1 + $0x38] sm:$0xff]  ;;  %v232_v38 = vadd.s32 4294967264, %v206_v31  ;;  %v246_v45 = vadd.s32 4294967248, %v206_v31 }
  0x21   :  { %v841_v9 = vpack.c.bf16 %v185_v8, %v184_v7  ;;  %v844_v12 = vpack.c.bf16 %v187_v11, %v186_v10  ;;  %vm559_vm11 = vcmask 1043456   ;;  %vm555_vm12 = vcmask 31744  }
  0x22   :  { %102 = vadd.xlane.f32.xlu1 %v101_v22  ;;  %836 = vmatpush3.bf16.msra.mxu0 %v835_v63  ;;  %vm737_vm13 = vcmask 516096  }
  0x23   :  { %78 = vadd.xlane.f32.xlu0 %v77_v23  ;;  %837 = vmatprep.subr.bf16.mxu0 %v923_v1 }
  0x24   :  { %848 = vmatpush3.bf16.msra.mxu1 %v835_v63 }
  0x25   :  { %849 = vmatprep.subr.bf16.mxu1 %v923_v1 }
  0x26   :  { %136 = vmax.xlane.f32.xlu1 %v135_v24  ;;  %839 = vmatpush3.bf16.msra.mxu0 %v838_v5 }
  0x27   :  { %133 = vmax.xlane.f32.xlu0 %v132_v25  ;;  %840 = vmatprep.subr.bf16.mxu0 %v923_v1 }
  0x28   :  { %851 = vmatpush3.bf16.msra.mxu1 %v838_v5 }
  0x29   :  { %852 = vmatprep.subr.bf16.mxu1 %v923_v1 }
  0x2a   :  { %160 = vmax.xlane.f32.xlu1 %v159_v26  ;;  %842 = vmatpush3.bf16.msra.mxu0 %v841_v9 }
  0x2b   :  { %157 = vmax.xlane.f32.xlu0 %v156_v27  ;;  %843 = vmatprep.subr.bf16.mxu0 %v923_v1 }
  0x2c   :  { %854 = vmatpush3.bf16.msra.mxu1 %v841_v9 }
  0x2d   :  { %855 = vmatprep.subr.bf16.mxu1 %v923_v1 }
  0x2e   :  { %105 = vadd.xlane.f32.xlu1 %v104_v32  ;;  %845 = vmatpush3.bf16.msra.mxu0 %v844_v12 }
  0x2f   :  { %81 = vadd.xlane.f32.xlu0 %v80_v33  ;;  %829 = vmatprep.subr.mxu0 %v925_v13  ;;  %v1008_v33 = vshrl.u32 %v205_v28, 7 }
  0x30   :  { %857 = vmatpush3.bf16.msra.mxu1 %v844_v12 }
  0x31   :  { %824 = vmatprep.subr.mxu1 %v925_v13  ;;  %v1021_v44 = vsub.s32 %v218_v36, %v1008_v33  ;;  %v1024_v47 = vsub.s32 %v225_v37, %v1008_v33  ;;  %v1033_v60 = vsub.s32 %v246_v45, %v1008_v33 }
  0x32   :  { %163 = vmax.xlane.f32.xlu1 %v162_v34 }
  0x33   :  { %139 = vmax.xlane.f32.xlu0 %v138_v35  ;;  %v211_v35 = vadd.s32 4294967288, %v206_v31 }
  0x36   :  { %108 = vadd.xlane.f32.xlu1 %v107_v40  ;;  %v1013_v40 = vsub.s32 %v206_v31, %v1008_v33 }
  0x37   :  { %84 = vadd.xlane.f32.xlu0 %v83_v41  ;;  %v239_v41 = vadd.s32 4294967256, %v206_v31 }
  0x39   :  { %v1030_v55 = vsub.s32 %v239_v41, %v1008_v33 }
  0x3a   :  { %166 = vmax.xlane.f32.xlu1 %v165_v42 }
  0x3b   :  { %142 = vmax.xlane.f32.xlu0 %v141_v43  ;;  %v1018_v43 = vsub.s32 %v211_v35, %v1008_v33 }
  0x3e   :  { %111 = vadd.xlane.f32.xlu1 %v110_v48 }
  0x3f   :  { %87 = vadd.xlane.f32.xlu0 %v86_v49 }
  0x42   :  { %169 = vmax.xlane.f32.xlu1 %v168_v50  ;;  %v1027_v50 = vsub.s32 %v232_v38, %v1008_v33 }
  0x43   :  { %145 = vmax.xlane.f32.xlu0 %v144_v51 }
  0x46   :  { %114 = vadd.xlane.f32.xlu1 %v113_v56 }
  0x47   :  { %90 = vadd.xlane.f32.xlu0 %v89_v57 }
  0x4a   :  { %172 = vmax.xlane.f32.xlu1 %v171_v58 }
  0x4b   :  { %148 = vmax.xlane.f32.xlu0 %v147_v59 }
  0x4e   :  { %175 = vmax.xlane.f32.xlu1 %v174_v62 }
  0x4f   :  { %151 = vmax.xlane.f32.xlu0 %v150_v0  ;;  %v253_v0 = vadd.s32 4294967240, %v206_v31 }
  0x52   :  { %178 = vmax.xlane.f32.xlu1 %v177_v4 }
  0x53   :  { %154 = vmax.xlane.f32.xlu0 %v153_v6 }
  0xa3   :  { %v94_v14 = vpop.xlane.xlu1 %93 }
  0xa4   :  { %v70_v15 = vpop.xlane.xlu0 %69  ;;  %v124_v52 = vmul.f32 0.00390625, %v94_v14 }
  0xa5   :  { %v116_v57 = vmul.f32 0.00390625, %v70_v15 }
  0xa6   :  { %v263_v6 = vrot.slane %v124_v52, %v1013_v40 }
  0xa7   :  { %v97_v16 = vpop.xlane.xlu1 %96  ;;  %v210_v11 = vrot.slane %v116_v57, %v1013_v40 }
  0xa8   :  { %v73_v17 = vpop.xlane.xlu0 %72  ;;  %v125_v46 = vmul.f32 0.00390625, %v97_v16 }
  0xa9   :  { %v117_v48 = vmul.f32 0.00390625, %v73_v17 }
  0xaa   :  { %v267_v61 = vrot.slane %v125_v46, %v1018_v43 }
  0xab   :  { %v100_v18 = vpop.xlane.xlu1 %99  ;;  %v215_v1 = vrot.slane %v117_v48, %v1018_v43 }
  0xac   :  { %v76_v19 = vpop.xlane.xlu0 %75  ;;  %v126_v49 = vmul.f32 0.00390625, %v100_v18  ;;  %v268_v15 = vsel %vm216_vm2, %v267_v61, %v263_v6  ;;  %v1052_v18 = vsub.s32 %v253_v0, %v1008_v33 }
  0xad   :  { %v118_v53 = vmul.f32 0.00390625, %v76_v19  ;;  %v217_v19 = vsel %vm216_vm2, %v215_v1, %v210_v11 }
  0xae   :  { %v272_v2 = vrot.slane %v126_v49, %v1021_v44 }
  0xaf   :  { %v103_v20 = vpop.xlane.xlu1 %102  ;;  %v222_v7 = vrot.slane %v118_v53, %v1021_v44 }
  0xb0   :  { %v79_v21 = vpop.xlane.xlu0 %78  ;;  %v127_v54 = vmul.f32 0.00390625, %v103_v20  ;;  %v273_v20 = vsel %vm223_vm3, %v272_v2, %v268_v15 }
  0xb1   :  { %v119_v58 = vmul.f32 0.00390625, %v79_v21  ;;  %v224_v28 = vsel %vm223_vm3, %v222_v7, %v217_v19 }
  0xb2   :  { %v277_v8 = vrot.slane %v127_v54, %v1024_v47 }
  0xb3   :  { %v996_v22 = vpop.xlane.xlu1 %136  ;;  %v229_v12 = vrot.slane %v119_v58, %v1024_v47 }
  0xb4   :  { %v998_v23 = vpop.xlane.xlu0 %133  ;;  %v278_v31 = vsel %vm230_vm4, %v277_v8, %v273_v20 }
  0xb5   :  { %v231_v36 = vsel %vm230_vm4, %v229_v12, %v224_v28  ;;  %v397_v61 = vrot.slane %v998_v23, %v1013_v40 }
  0xb7   :  { %v1000_v24 = vpop.xlane.xlu1 %160 }
  0xb8   :  { %v1002_v25 = vpop.xlane.xlu0 %157  ;;  %v440_v53 = vrot.slane %v1000_v24, %v1018_v43 }
  0xb9   :  { %v436_v54 = vrot.slane %v1002_v25, %v1013_v40 }
  0xbb   :  { %v106_v26 = vpop.xlane.xlu1 %105 }
  0xbc   :  { %v82_v27 = vpop.xlane.xlu0 %81  ;;  %v128_v59 = vmul.f32 0.00390625, %v106_v26 }
  0xbd   :  { %v120_v62 = vmul.f32 0.00390625, %v82_v27 }
  0xbe   :  { %v282_v14 = vrot.slane %v128_v59, %v1027_v50  ;;  %v401_v59 = vrot.slane %v996_v22, %v1018_v43 }
  0xbf   :  { %v1004_v29 = vpop.xlane.xlu1 %163  ;;  %v236_v16 = vrot.slane %v120_v62, %v1027_v50 }
  0xc0   :  { %v1006_v30 = vpop.xlane.xlu0 %139  ;;  %v283_v37 = vsel %vm237_vm5, %v282_v14, %v278_v31  ;;  %v445_v62 = vrot.slane %v1004_v29, %v1021_v44  ;;  %v441_v29 = vsel %vm216_vm2, %v440_v53, %v436_v54 }
  0xc1   :  { %v238_v41 = vsel %vm237_vm5, %v236_v16, %v231_v36  ;;  %v406_v24 = vrot.slane %v1006_v30, %v1021_v44 }
  0xc3   :  { %v109_v32 = vpop.xlane.xlu1 %108 }
  0xc4   :  { %v85_v34 = vpop.xlane.xlu0 %84  ;;  %v129_v63 = vmul.f32 0.00390625, %v109_v32 }
  0xc5   :  { %v121_v3 = vmul.f32 0.00390625, %v85_v34 }
  0xc6   :  { %v287_v17 = vrot.slane %v129_v63, %v1030_v55 }
  0xc7   :  { %v1010_v39 = vpop.xlane.xlu1 %166  ;;  %v243_v21 = vrot.slane %v121_v3, %v1030_v55 }
  0xc8   :  { %v1015_v42 = vpop.xlane.xlu0 %142  ;;  %v288_v45 = vsel %vm244_vm6, %v287_v17, %v283_v37  ;;  %v450_v25 = vrot.slane %v1010_v39, %v1024_v47  ;;  %v402_v39 = vsel %vm216_vm2, %v401_v59, %v397_v61  ;;  %v550_v17 = vld [vmem:[%s1142_s2] sm:$0xf]  ;;  %s927_s2 = smov [#allocation7]  }
  0xc9   :  { %v245_v48 = vsel %vm244_vm6, %v243_v21, %v238_v41  ;;  %v411_v1 = vrot.slane %v1015_v42, %v1024_v47  ;;  %v446_v42 = vsel %vm223_vm3, %v445_v62, %v441_v29  ;;  %v407_v2 = vsel %vm223_vm3, %v406_v24, %v402_v39  ;;  %s745_s15 = sshll.u32 %s927_s2, 4  ;;  %s746_s15 = int_to_ptr.vmem [resolvable:$true] %s745_s15 }
  0xca   :  { %v451_v3 = vsel %vm230_vm4, %v450_v25, %v446_v42  ;;  %s894_s16 = scalar_lea.vmem %s746_s15, 32  ;;  %p899_p9 = scmp.lt.s32.totalorder %s746_s15, %s746_s15 }
  0xcb   :  { %v112_v51 = vpop.xlane.xlu1 %111  ;;  %p895_p8 = scmp.ne.s32.totalorder %s746_s15, %s894_s16  ;;  %p900_p10 = scmp.lt.s32.totalorder %s894_s16, %s894_s16 }
  0xcc   :  { %v88_v56 = vpop.xlane.xlu0 %87  ;;  %v130_v4 = vmul.f32 0.00390625, %v112_v51 }
  0xcd   :  { %v122_v9 = vmul.f32 0.00390625, %v88_v56  ;;  %p901_p11 = por %p900_p10, %p899_p9 }
  0xce   :  { %v292_v26 = vrot.slane %v130_v4, %v1033_v60  ;;  %v412_v4 = vsel %vm230_vm4, %v411_v1, %v407_v2 }
  0xcf   :  { %v1038_v5 = vpop.xlane.xlu1 %169  ;;  %v250_v32 = vrot.slane %v122_v9, %v1033_v60  ;;  %p902_p12 = pnand %p901_p11, %p895_p8 }
  0xd0   :  { %v1043_v10 = vpop.xlane.xlu0 %145  ;;  %v293_v49 = vsel %vm251_vm7, %v292_v26, %v288_v45  ;;  %v455_v22 = vrot.slane %v1038_v5, %v1027_v50  ;;  %v377_v26 = vld [vmem:[#allocation3] sm:$0x3] }
  0xd1   :  { %v252_v56 = vsel %vm251_vm7, %v250_v32, %v245_v48  ;;  %v416_v40 = vrot.slane %v1043_v10, %v1027_v50 }
  0xd2   :  { %v456_v5 = vsel %vm237_vm5, %v455_v22, %v451_v3 }
  0xd3   :  { %v115_v27 = vpop.xlane.xlu1 %114  ;;  %v417_v7 = vsel %vm237_vm5, %v416_v40, %v412_v4 }
  0xd4   :  { %v131_v34 = vmul.f32 0.00390625, %v115_v27  ;;  %v91_v35 = vpop.xlane.xlu0 %90 }
  0xd5   :  { %v123_v38 = vmul.f32 0.00390625, %v91_v35 }
  0xd6   :  { %v297_v46 = vrot.slane %v131_v34, %v1052_v18 }
  0xd7   :  { %v257_v51 = vrot.slane %v123_v38, %v1052_v18  ;;  %v173_v52 = vpop.xlane.xlu1 %172 }
  0xd8   :  { %v149_v57 = vpop.xlane.xlu0 %148  ;;  %v298_v58 = vsel %vm258_vm8, %v297_v46, %v293_v49  ;;  %v460_v30 = vrot.slane %v173_v52, %v1030_v55 }
  0xd9   :  { %v259_v63 = vsel %vm258_vm8, %v257_v51, %v252_v56  ;;  %v421_v44 = vrot.slane %v149_v57, %v1030_v55  ;;  %v926_v51 = vmov 1966171168  }
  0xda   :  { %v300_v0 = vsel %vm299_vm9, %v298_v58, %v259_v63  ;;  %v461_v8 = vsel %vm244_vm6, %v460_v30, %v456_v5  ;;  %v714_v52 = vunpack.c.l.s4 %v926_v51 }
  0xdb   :  { %803 = vmatmul.mubr.msk.f32.vlgmr.msra.gmra.mrb[0].mxu0 %vm301_vm10, %v300_v0  ;;  %v176_v23 = vpop.xlane.xlu1 %175  ;;  %v422_v10 = vsel %vm244_vm6, %v421_v44, %v417_v7 }
  0xdc   :  { %v152_v43 = vpop.xlane.xlu0 %151  ;;  %831 = vmatprep.mubr.msk.f32.mxu0 %vm924_vm0, %v925_v13  ;;  %v465_v47 = vrot.slane %v176_v23, %v1033_v60  ;;  %830 = vmatpush3.msk.msra.mxu0 %vm559_vm11, %v550_v17  ;;  %v715_v53 = vunpack.c.0.s8 %v714_v52 }
  0xdd   :  { %v426_v50 = vrot.slane %v152_v43, %v1033_v60 }
  0xde   :  { %v466_v11 = vsel %vm251_vm7, %v465_v47, %v461_v8  ;;  %v718_v54 = vsub.s32 %v715_v53, %v1008_v33 }
  0xdf   :  { %v179_v6 = vpop.xlane.xlu1 %178  ;;  %v427_v60 = vsel %vm251_vm7, %v426_v50, %v422_v10 }
  0xe0   :  { %v470_v9 = vrot.slane %v179_v6, %v1052_v18  ;;  %v155_v55 = vpop.xlane.xlu0 %154 }
  0xe1   :  { %v431_v12 = vrot.slane %v155_v55, %v1052_v18  ;;  %v188_v18 = vld [vmem:[#allocation2] sm:$0x3] }
  0xe2   :  { %v471_v14 = vsel %vm258_vm8, %v470_v9, %v466_v11 }
  0xe3   :  { %v432_v15 = vsel %vm258_vm8, %v431_v12, %v427_v60 }
  0xe4   :  { %v472_v16 = vsel %vm299_vm9, %v471_v14, %v432_v15 }
  0xe5   :  { %822 = vmatmul.mubr.msk.f32.vlgmr.msra.gmra.mrb[0].mxu1 %vm301_vm10, %v472_v16 }
  0xe6   :  { %826 = vmatprep.mubr.msk.f32.mxu1 %vm924_vm0, %v925_v13  ;;  %825 = vmatpush3.msk.msra.mxu1 %vm559_vm11, %v550_v17 }
 0x1ae   :  { %v370_v19 = vpop.f32.mrb[0].mxu0 }
 0x1af   :  { %v374_v20 = vadd.f32 %v370_v19, %v188_v18  ;;  %v804_v21 = vpop.f32.mrb[1].mxu0 }
 0x1b1   :  { %376 = vst.msk [vmem:[#allocation2] sm:$0x3] %vm33_vm1, %v374_v20 }
 0x1b8   :  { %v541_v27 = vpop.f32.mrb[0].mxu1  ;;  %v551_v28 = vld [vmem:[#allocation2] sm:$0x3] }
 0x1b9   :  { %v545_v31 = vadd.f32 %v541_v27, %v377_v26  ;;  %v823_v32 = vpop.f32.mrb[1].mxu1  ;;  %v552_v13 = vmax.f32 %v551_v28, 0.0 }
 0x1bb   :  { %546 = vst.msk [vmem:[#allocation3] sm:$0x3] %vm33_vm1, %v545_v31  ;;  %832 = vmatmul.mubr.msk.f32.vlgmr.msra.gmra.mrb[2].mxu0 %vm555_vm12, %v552_v13 }
 0x1c2   :  { %v553_v34 = vld [vmem:[#allocation3] sm:$0x3] }
 0x1c3   :  { %v554_v35 = vmax.f32 %v553_v34, 0.0 }
 0x1c5   :  { %827 = vmatmul.mubr.msk.f32.vlgmr.msra.gmra.mrb[2].mxu1 %vm555_vm12, %v554_v35 }
 0x28e   :  { %v702_v36 = vpop.f32.mrb[2].mxu0 }
 0x28f   :  { %v833_v37 = vpop.f32.mrb[3].mxu0 }
 0x298   :  { %v629_v38 = vpop.f32.mrb[2].mxu1 }
 0x299   :  { %v703_v41 = vadd.f32 %v702_v36, %v629_v38  ;;  %v828_v45 = vpop.f32.mrb[3].mxu1 }
 0x29b   :  { %v763_v46 = vmul.f32 -1.442695, %v703_v41 }
 0x29d   :  { %868 = vpow2.f32 %v763_v46 }
 0x2a7   :  { %v869_v48 = vpop.eup %868 }
 0x2a8   :  { %v709_v49 = vadd.f32 1.0, %v869_v48 }
 0x2aa   :  { %870 = vrcp.f32 %v709_v49 }
 0x2b4   :  { %v871_v56 = vpop.eup %870 }
 0x2b5   :  { %v719_v57 = vrot.slane %v871_v56, %v718_v54 }
 0x2b7   :  { %v720_v58 = vcombine.high %v719_v57, %v719_v57  ;;  %v727_v59 = vrot.slane %v719_v57, %v718_v54 }
 0x2b9   :  { %v734_v61 = vrot.slane %v720_v58, %v718_v54  ;;  %738 = vst.msk [vmem:[#allocation7] sm:$0x1] %vm737_vm13, %v727_v59 }
 0x2bb   :  { %739 = vst.msk [vmem:[#allocation7 + $0x1] sm:$0x1] %vm737_vm13, %v734_v61 }
 0x2bc   :  { %905 = shalt.err (!%p902_p12)
}
 0x2bd   :  { %s906_s19 = scalar_lea.hbm %s1143_s3, 32 }
 0x2be   :  { %p907_p13 = scmp.ne.s32.totalorder %s1143_s3, %s906_s19  ;;  %p910_p0 = scmp.lt.u32.totalorder %s906_s19, %s1143_s3 }
 0x2c0   :  { %p912_p1 = pnand %p910_p0, %p907_p13 }
 0x2c2   :  { %915 = shalt.err (!%p912_p1)
}
 0x2c3   :  { %s928_s25 = smov 1  }
 0x2c4   :  { %751 = dma.vmem_to_hbm [thread:$0]  %s746_s15, 32, %s1143_s3, [#allocation6], %s922_s23, %s922_s23, %s928_s25  }
 0x2c5   :  { %918 = dma.done.wait [#allocation6], 32  }
 0x2c6   :  { %919 = vsyncadd [#allocation6], 4294967264 }
 0x2c7   :  { %755 = vsyncpa [#allocation5], 1 }
 0x2c8   :  { %756 = vsyncpa [#allocation6], 1 }

</bundles_post_ra>
